<compile_context>
chip_gen: v6e
topology: v6e:2x2x1
jax: 0.10.0
libtpu: 0.0.40
codegen_flags: <defaults>
</compile_context>

<pallas_src>
import functools

import jax
import jax.numpy as jnp
from jax.experimental import pallas as pl
from jax.experimental.pallas import tpu as pltpu


def _round_up(n, m):
    return ((n + m - 1) // m) * m


def _silu(h):
    # SiLU via tanh: sigmoid(h) = 0.5*(1 + tanh(0.5*h)) -> one EUP push per activation
    # (instead of exp + reciprocal). Math stays f32 on all generations.
    return h * (0.5 * (1.0 + jnp.tanh(0.5 * h)))


def _ensemble_mlp_kernel(x_ref, w1_ref, b1_ref, w2_ref, b2_ref, w3_ref, b3_ref, y_ref):
    # x_ref : (B, D_in)        f32  (cast to bf16 in-kernel)
    # w1_ref: (D_in, E*H)      bf16 (layer 1 fused across the ensemble)
    # b1_ref: (1, E*H)         f32
    # w2_ref: (E*H, E*H)       bf16 (block-diagonal)
    # b2_ref: (1, E*H)         f32
    # w3_ref: (E*H, OUT_PAD)   bf16 (block-diagonal, zero-padded to a 128-lane multiple)
    # b3_ref: (1, OUT_PAD)     f32
    # y_ref : (B, OUT_PAD)     f32  lane-dense output slab
    cdt = w1_ref.dtype  # matmul operand dtype (bf16)

    x = x_ref[...].astype(cdt)                                           # (B, D_in)

    # Layer 1: fused across the ensemble -> one (B, D_in) x (D_in, E*H) matmul.
    h1 = jnp.dot(x, w1_ref[...], preferred_element_type=jnp.float32)
    h1 = _silu(h1 + b1_ref[...])                                         # (B, E*H) f32

    # Layer 2: one (B, E*H) x (E*H, E*H) block-diagonal matmul.
    h2 = jnp.dot(h1.astype(cdt), w2_ref[...], preferred_element_type=jnp.float32)
    h2 = _silu(h2 + b2_ref[...])                                         # (B, E*H) f32

    # Layer 3: one (B, E*H) x (E*H, OUT_PAD) block-diagonal matmul, lane-dense store.
    y = jnp.dot(h2.astype(cdt), w3_ref[...], preferred_element_type=jnp.float32)
    y_ref[...] = (y + b3_ref[...]).astype(y_ref.dtype)                   # (B, OUT_PAD)


def pack_params(params, compute_dtype=jnp.bfloat16):
    """One-time (init / param-update time) repack of the per-member parameters.

    Layer 1 is fused across the ensemble (columns grouped per member); layers 2 and 3
    are packed as block-diagonal matrices so the kernel runs three lane-full matmuls.
    Done OFF the hot forward path per the performance review.
    """
    w1, b1, w2, b2, w3, b3 = params
    E, D_in, H = w1.shape
    two_out = w3.shape[-1]
    EH = E * H
    out_pad = _round_up(E * two_out, 128)

    # Layer 1: (E, D_in, H) -> (D_in, E*H); column block e is member e's W1.
    w1_all = jnp.transpose(w1, (1, 0, 2)).reshape(D_in, EH).astype(compute_dtype)
    b1_all = b1.reshape(1, EH).astype(jnp.float32)

    # Layer 2: block-diagonal (E*H, E*H).
    w2_bd = jnp.zeros((EH, EH), jnp.float32)
    for e in range(E):
        w2_bd = w2_bd.at[e * H:(e + 1) * H, e * H:(e + 1) * H].set(w2[e])
    w2_bd = w2_bd.astype(compute_dtype)
    b2_all = b2.reshape(1, EH).astype(jnp.float32)

    # Layer 3: block-diagonal (E*H, E*2*O), zero-padded to a 128-lane multiple.
    w3_bd = jnp.zeros((EH, out_pad), jnp.float32)
    b3_all = jnp.zeros((1, out_pad), jnp.float32)
    for e in range(E):
        w3_bd = w3_bd.at[e * H:(e + 1) * H, e * two_out:(e + 1) * two_out].set(w3[e])
        b3_all = b3_all.at[:, e * two_out:(e + 1) * two_out].set(b3[e])
    w3_bd = w3_bd.astype(compute_dtype)

    return (w1_all, b1_all, w2_bd, b2_all, w3_bd, b3_all)


@functools.partial(jax.jit, static_argnames=("ensemble_size", "output_dim"))
def ensemble_forward(x, packed_params, *, ensemble_size, output_dim):
    """Runs the full ensemble. Returns (means, logvars), each (E, B, output_dim)."""
    w1_all, b1_all, w2_bd, b2_all, w3_bd, b3_all = packed_params
    B, D_in = x.shape
    EH = w1_all.shape[1]
    out_pad = w3_bd.shape[1]
    E, O = ensemble_size, output_dim
    two_out = 2 * O

    y_slab = pl.pallas_call(
        _ensemble_mlp_kernel,
        out_shape=jax.ShapeDtypeStruct((B, out_pad), jnp.float32),
        grid=(1,),  # single step: everything stays VMEM-resident for the whole call
        in_specs=[
            pl.BlockSpec((B, D_in), lambda i: (0, 0)),       # x (f32; cast in-kernel)
            pl.BlockSpec((D_in, EH), lambda i: (0, 0)),      # W1_all (bf16)
            pl.BlockSpec((1, EH), lambda i: (0, 0)),         # b1_all (f32)
            pl.BlockSpec((EH, EH), lambda i: (0, 0)),        # W2 block-diag (bf16)
            pl.BlockSpec((1, EH), lambda i: (0, 0)),         # b2_all (f32)
            pl.BlockSpec((EH, out_pad), lambda i: (0, 0)),   # W3 block-diag (bf16)
            pl.BlockSpec((1, out_pad), lambda i: (0, 0)),    # b3_all (f32)
        ],
        out_specs=pl.BlockSpec((B, out_pad), lambda i: (0, 0)),
        compiler_params=pltpu.CompilerParams(
            dimension_semantics=("arbitrary",)),
    )(x, w1_all, b1_all, w2_bd, b2_all, w3_bd, b3_all)

    # Lane-dense store inside the kernel; the cheap split/reshape into (E, B, O)
    # means/logvars happens here in the wrapper.
    y = y_slab[:, :E * two_out].reshape(B, E, two_out)
    y = jnp.transpose(y, (1, 0, 2))                          # (E, B, 2*O)
    return y[:, :, :O], y[:, :, O:]


def init_params(key, input_dim, output_dim, hidden_units, ensemble_size):
    """Deterministic synthetic parameters (shapes match the PyTorch module)."""
    ks = jax.random.split(key, 6)
    scale1 = 1.0 / jnp.sqrt(input_dim)
    scale2 = 1.0 / jnp.sqrt(hidden_units)
    w1 = jax.random.normal(ks[0], (ensemble_size, input_dim, hidden_units),
                           jnp.float32) * scale1
    b1 = jax.random.normal(ks[1], (ensemble_size, 1, hidden_units),
                           jnp.float32) * 0.01
    w2 = jax.random.normal(ks[2], (ensemble_size, hidden_units, hidden_units),
                           jnp.float32) * scale2
    b2 = jax.random.normal(ks[3], (ensemble_size, 1, hidden_units),
                           jnp.float32) * 0.01
    w3 = jax.random.normal(ks[4], (ensemble_size, hidden_units, output_dim * 2),
                           jnp.float32) * scale2
    b3 = jax.random.normal(ks[5], (ensemble_size, 1, output_dim * 2),
                           jnp.float32) * 0.01
    return (w1, b1, w2, b2, w3, b3)


def reference_forward(x, params, output_dim, cast_dtype=None):
    """Pure-JAX reference matching the PyTorch forward semantics.

    If cast_dtype is set, matmul operands (x, weights, intermediate activations) are
    rounded through that dtype to mirror the kernel's bf16 MXU operands with f32 acc.
    """
    w1, b1, w2, b2, w3, b3 = params
    rnd = (lambda a: a.astype(cast_dtype).astype(jnp.float32)) if cast_dtype \
        else (lambda a: a)
    x, w1, w2, w3 = rnd(x), rnd(w1), rnd(w2), rnd(w3)
    h1 = jax.nn.silu(jnp.einsum("bi,eih->ebh", x, w1) + b1)
    h2 = jax.nn.silu(jnp.einsum("ebh,ehk->ebk", rnd(h1), w2) + b2)
    y = jnp.einsum("ebh,eho->ebo", rnd(h2), w3) + b3
    return y[:, :, :output_dim], y[:, :, output_dim:]


if __name__ == "__main__":
    # Small shapes consistent with the module: batch=2, input_dim=16,
    # hidden_units=32, output_dim=8, ensemble_size=4 (so E*H = 128 lanes,
    # E*2*O = 64 padded to 128 output lanes).
    batch, input_dim, hidden_units, output_dim, ensemble_size = 2, 16, 32, 8, 4

    key = jax.random.PRNGKey(0)
    kx, kp = jax.random.split(key)
    x = jax.random.normal(kx, (batch, input_dim), jnp.float32)
    params = init_params(kp, input_dim, output_dim, hidden_units, ensemble_size)

    # Parameter repacking happens ONCE here (init / param-update time), not per call.
    packed = pack_params(params)

    means, logvars = ensemble_forward(x, packed,
                                      ensemble_size=ensemble_size,
                                      output_dim=output_dim)
    jax.block_until_ready((means, logvars))

    # Reference mirrors the kernel's bf16 matmul operands (f32 accumulation).
    ref_means, ref_logvars = reference_forward(x, params, output_dim,
                                               cast_dtype=jnp.bfloat16)
    assert means.shape == (ensemble_size, batch, output_dim)
    assert logvars.shape == (ensemble_size, batch, output_dim)
    assert jnp.allclose(means, ref_means, atol=2e-2, rtol=2e-2)
    assert jnp.allclose(logvars, ref_logvars, atol=2e-2, rtol=2e-2)

    print("KERNEL_OK")
</pallas_src>

<mosaic_0001>
module attributes {stable_mosaic.version = 11 : i64} {
  func.func @_ensemble_mlp_kernel(%arg0: i32, %arg1: memref<2x16xf32, #tpu.memory_space<vmem>>, %arg2: memref<16x128xbf16, #tpu.memory_space<vmem>>, %arg3: memref<1x128xf32, #tpu.memory_space<vmem>>, %arg4: memref<128x128xbf16, #tpu.memory_space<vmem>>, %arg5: memref<1x128xf32, #tpu.memory_space<vmem>>, %arg6: memref<128x128xbf16, #tpu.memory_space<vmem>>, %arg7: memref<1x128xf32, #tpu.memory_space<vmem>>, %arg8: memref<2x128xf32, #tpu.memory_space<vmem>>) attributes {dimension_semantics = [#tpu.dimension_semantics<arbitrary>], iteration_bounds = array<i64: 1>, scalar_prefetch = 0 : i64, scratch_operands = 0 : i64, tpu.core_type = #tpu.core_type<tc>, window_params = [{pipeline_mode = #tpu.pipeline_mode<synchronous>, transform_indices = @transform_0, window_bounds = array<i64: 2, 16>}, {pipeline_mode = #tpu.pipeline_mode<synchronous>, transform_indices = @transform_1, window_bounds = array<i64: 16, 128>}, {pipeline_mode = #tpu.pipeline_mode<synchronous>, transform_indices = @transform_2, window_bounds = array<i64: 1, 128>}, {pipeline_mode = #tpu.pipeline_mode<synchronous>, transform_indices = @transform_3, window_bounds = array<i64: 128, 128>}, {pipeline_mode = #tpu.pipeline_mode<synchronous>, transform_indices = @transform_4, window_bounds = array<i64: 1, 128>}, {pipeline_mode = #tpu.pipeline_mode<synchronous>, transform_indices = @transform_5, window_bounds = array<i64: 128, 128>}, {pipeline_mode = #tpu.pipeline_mode<synchronous>, transform_indices = @transform_6, window_bounds = array<i64: 1, 128>}, {pipeline_mode = #tpu.pipeline_mode<synchronous>, transform_indices = @transform_7, window_bounds = array<i64: 2, 128>}]} {
    %c0 = arith.constant 0 : index
    %c0_0 = arith.constant 0 : index
    %0 = vector.load %arg1[%c0, %c0_0] : memref<2x16xf32, #tpu.memory_space<vmem>>, vector<2x16xf32>
    %1 = arith.truncf %0 : vector<2x16xf32> to vector<2x16xbf16>
    %c0_1 = arith.constant 0 : index
    %c0_2 = arith.constant 0 : index
    %2 = vector.load %arg2[%c0_1, %c0_2] : memref<16x128xbf16, #tpu.memory_space<vmem>>, vector<16x128xbf16>
    %cst = arith.constant dense<0.000000e+00> : vector<2x128xf32>
    %3 = tpu.matmul %1, %2, %cst {dimension_numbers = #tpu.dot_dimension_numbers<[1], [0], [0], [1], [0, 0, 1, 1], [], []>} : vector<2x16xbf16>, vector<16x128xbf16>, vector<2x128xf32> -> vector<2x128xf32>
    %c0_3 = arith.constant 0 : index
    %c0_4 = arith.constant 0 : index
    %4 = vector.load %arg3[%c0_3, %c0_4] : memref<1x128xf32, #tpu.memory_space<vmem>>, vector<1x128xf32>
    %5 = vector.broadcast %4 : vector<1x128xf32> to vector<2x128xf32>
    %6 = arith.addf %3, %5 : vector<2x128xf32>
    %cst_5 = arith.constant 5.000000e-01 : f32
    %7 = vector.broadcast %cst_5 : f32 to vector<2x128xf32>
    %8 = arith.mulf %7, %6 : vector<2x128xf32>
    %9 = math.tanh %8 : vector<2x128xf32>
    %cst_6 = arith.constant 1.000000e+00 : f32
    %10 = vector.broadcast %cst_6 : f32 to vector<2x128xf32>
    %11 = arith.addf %10, %9 : vector<2x128xf32>
    %cst_7 = arith.constant 5.000000e-01 : f32
    %12 = vector.broadcast %cst_7 : f32 to vector<2x128xf32>
    %13 = arith.mulf %12, %11 : vector<2x128xf32>
    %14 = arith.mulf %6, %13 : vector<2x128xf32>
    %15 = arith.truncf %14 : vector<2x128xf32> to vector<2x128xbf16>
    %c0_8 = arith.constant 0 : index
    %c0_9 = arith.constant 0 : index
    %16 = vector.load %arg4[%c0_8, %c0_9] : memref<128x128xbf16, #tpu.memory_space<vmem>>, vector<128x128xbf16>
    %cst_10 = arith.constant dense<0.000000e+00> : vector<2x128xf32>
    %17 = tpu.matmul %15, %16, %cst_10 {dimension_numbers = #tpu.dot_dimension_numbers<[1], [0], [0], [1], [0, 0, 1, 1], [], []>} : vector<2x128xbf16>, vector<128x128xbf16>, vector<2x128xf32> -> vector<2x128xf32>
    %c0_11 = arith.constant 0 : index
    %c0_12 = arith.constant 0 : index
    %18 = vector.load %arg5[%c0_11, %c0_12] : memref<1x128xf32, #tpu.memory_space<vmem>>, vector<1x128xf32>
    %19 = vector.broadcast %18 : vector<1x128xf32> to vector<2x128xf32>
    %20 = arith.addf %17, %19 : vector<2x128xf32>
    %cst_13 = arith.constant 5.000000e-01 : f32
    %21 = vector.broadcast %cst_13 : f32 to vector<2x128xf32>
    %22 = arith.mulf %21, %20 : vector<2x128xf32>
    %23 = math.tanh %22 : vector<2x128xf32>
    %cst_14 = arith.constant 1.000000e+00 : f32
    %24 = vector.broadcast %cst_14 : f32 to vector<2x128xf32>
    %25 = arith.addf %24, %23 : vector<2x128xf32>
    %cst_15 = arith.constant 5.000000e-01 : f32
    %26 = vector.broadcast %cst_15 : f32 to vector<2x128xf32>
    %27 = arith.mulf %26, %25 : vector<2x128xf32>
    %28 = arith.mulf %20, %27 : vector<2x128xf32>
    %29 = arith.truncf %28 : vector<2x128xf32> to vector<2x128xbf16>
    %c0_16 = arith.constant 0 : index
    %c0_17 = arith.constant 0 : index
    %30 = vector.load %arg6[%c0_16, %c0_17] : memref<128x128xbf16, #tpu.memory_space<vmem>>, vector<128x128xbf16>
    %cst_18 = arith.constant dense<0.000000e+00> : vector<2x128xf32>
    %31 = tpu.matmul %29, %30, %cst_18 {dimension_numbers = #tpu.dot_dimension_numbers<[1], [0], [0], [1], [0, 0, 1, 1], [], []>} : vector<2x128xbf16>, vector<128x128xbf16>, vector<2x128xf32> -> vector<2x128xf32>
    %c0_19 = arith.constant 0 : index
    %c0_20 = arith.constant 0 : index
    %32 = vector.load %arg7[%c0_19, %c0_20] : memref<1x128xf32, #tpu.memory_space<vmem>>, vector<1x128xf32>
    %33 = vector.broadcast %32 : vector<1x128xf32> to vector<2x128xf32>
    %34 = arith.addf %31, %33 : vector<2x128xf32>
    %c0_21 = arith.constant 0 : index
    %c0_22 = arith.constant 0 : index
    %35 = vector.load %arg8[%c0_21, %c0_22] : memref<2x128xf32, #tpu.memory_space<vmem>>, vector<2x128xf32>
    tpu.vector_store %arg8[%c0_21, %c0_22], %34 {strides = array<i32>} : memref<2x128xf32, #tpu.memory_space<vmem>>, vector<2x128xf32>,
    return
  }
  func.func @transform_0(%arg0: i32) -> (i32, i32) {
    %c0_i32 = arith.constant 0 : i32
    %c0_i32_0 = arith.constant 0 : i32
    %c0_i32_1 = arith.constant 0 : i32
    return %c0_i32, %c0_i32_0 : i32, i32
  }
  func.func @transform_1(%arg0: i32) -> (i32, i32) {
    %c0_i32 = arith.constant 0 : i32
    %c0_i32_0 = arith.constant 0 : i32
    %c0_i32_1 = arith.constant 0 : i32
    return %c0_i32, %c0_i32_0 : i32, i32
  }
  func.func @transform_2(%arg0: i32) -> (i32, i32) {
    %c0_i32 = arith.constant 0 : i32
    %c0_i32_0 = arith.constant 0 : i32
    %c0_i32_1 = arith.constant 0 : i32
    return %c0_i32, %c0_i32_0 : i32, i32
  }
  func.func @transform_3(%arg0: i32) -> (i32, i32) {
    %c0_i32 = arith.constant 0 : i32
    %c0_i32_0 = arith.constant 0 : i32
    %c0_i32_1 = arith.constant 0 : i32
    return %c0_i32, %c0_i32_0 : i32, i32
  }
  func.func @transform_4(%arg0: i32) -> (i32, i32) {
    %c0_i32 = arith.constant 0 : i32
    %c0_i32_0 = arith.constant 0 : i32
    %c0_i32_1 = arith.constant 0 : i32
    return %c0_i32, %c0_i32_0 : i32, i32
  }
  func.func @transform_5(%arg0: i32) -> (i32, i32) {
    %c0_i32 = arith.constant 0 : i32
    %c0_i32_0 = arith.constant 0 : i32
    %c0_i32_1 = arith.constant 0 : i32
    return %c0_i32, %c0_i32_0 : i32, i32
  }
  func.func @transform_6(%arg0: i32) -> (i32, i32) {
    %c0_i32 = arith.constant 0 : i32
    %c0_i32_0 = arith.constant 0 : i32
    %c0_i32_1 = arith.constant 0 : i32
    return %c0_i32, %c0_i32_0 : i32, i32
  }
  func.func @transform_7(%arg0: i32) -> (i32, i32) {
    %c0_i32 = arith.constant 0 : i32
    %c0_i32_0 = arith.constant 0 : i32
    %c0_i32_1 = arith.constant 0 : i32
    return %c0_i32, %c0_i32_0 : i32, i32
  }
}

</mosaic_0001>

<bundles_post_ra>
// kernel: ensemble_forward.1
= control target key start
LH: loop header
LB: loop body
LE: loop exit
PB: predicated region body
PF: predicated region fallthrough
CT: control target
= control target key end

     0   :  { %12 = vsyncpa [#allocation3], 0  ;;  %s686_s0 = inlined_call_operand.hbm [shape: f32[2,16], index: 0, kind: input, shape index: {}]   ;;  %s687_s1 = inlined_call_operand.hbm [shape: bf16[16,128], index: 1, kind: input, shape index: {}]   ;;  %s688_s2 = inlined_call_operand.vmem [shape: f32[1,128], index: 2, kind: input, shape index: {}]   ;;  %s689_s3 = inlined_call_operand.hbm [shape: bf16[128,128], index: 3, kind: input, shape index: {}]   ;;  %s690_s4 = inlined_call_operand.vmem [shape: f32[1,128], index: 4, kind: input, shape index: {}]   ;;  %s691_s5 = inlined_call_operand.hbm [shape: bf16[128,128], index: 5, kind: input, shape index: {}]   ;;  %s692_s6 = inlined_call_operand.vmem [shape: f32[1,128], index: 6, kind: input, shape index: {}]   ;;  %s693_s7 = inlined_call_operand.vmem [shape: f32[2,128], index: 7, kind: output, shape index: {}]  }
   0x1   :  { %13 = vsyncpa [#allocation5], 0 }
   0x2   :  { %14 = vsyncpa [#allocation8], 0  ;;  %s585_s24 = smov [#allocation4]  }
   0x3   :  { %s30_s25 = sshll.u32 %s585_s24, 4  ;;  %s31_s25 = int_to_ptr.vmem [resolvable:$true] %s30_s25 }
   0x4   :  { %s507_s26 = scalar_lea.vmem %s31_s25, 128  ;;  %p512_p1 = scmp.lt.s32.totalorder %s31_s25, %s31_s25 }
   0x5   :  { %p508_p0 = scmp.ne.s32.totalorder %s31_s25, %s507_s26  ;;  %p513_p2 = scmp.lt.s32.totalorder %s507_s26, %s507_s26 }
   0x7   :  { %p514_p3 = por %p513_p2, %p512_p1 }
   0x9   :  { %p515_p4 = pnand %p514_p3, %p508_p0 }
   0xb   :  { %518 = shalt.err (!%p515_p4)
}
   0xc   :  { %s586_s27 = smov 64   ;;  %s587_s28 = smov 4  }
   0xd   :  { %36 = dma.hbm_to_vmem [thread:$0]  %s687_s1, 128, %s31_s25, [#allocation5], %s586_s27, %s586_s27, %s587_s28  }
   0xe   :  { %s588_s8 = smov [#allocation2]   ;;  %s589_s10 = smov [#allocation6]  }
   0xf   :  { %s21_s9 = sshll.u32 %s588_s8, 4  ;;  %s44_s11 = sshll.u32 %s589_s10, 4  ;;  %s22_s9 = int_to_ptr.vmem [resolvable:$true] %s21_s9  ;;  %s45_s11 = int_to_ptr.vmem [resolvable:$true] %s44_s11 }
  0x10   :  { %s527_s12 = scalar_lea.vmem %s22_s9, 32  ;;  %p532_p6 = scmp.lt.s32.totalorder %s22_s9, %s22_s9 }
  0x11   :  { %p528_p5 = scmp.ne.s32.totalorder %s22_s9, %s527_s12  ;;  %p533_p7 = scmp.lt.s32.totalorder %s527_s12, %s527_s12 }
  0x13   :  { %p534_p8 = por %p533_p7, %p532_p6 }
  0x15   :  { %p535_p9 = pnand %p534_p8, %p528_p5 }
  0x17   :  { %538 = shalt.err (!%p535_p9)
}
  0x18   :  { %24 = dma.hbm_to_vmem [thread:$0]  %s686_s0, 32, %s22_s9, [#allocation3]  }
  0x19   :  { %s547_s15 = scalar_lea.vmem %s45_s11, 1024  ;;  %p552_p11 = scmp.lt.s32.totalorder %s45_s11, %s45_s11 }
  0x1a   :  { %p548_p10 = scmp.ne.s32.totalorder %s45_s11, %s547_s15  ;;  %p553_p12 = scmp.lt.s32.totalorder %s547_s15, %s547_s15 }
  0x1c   :  { %p554_p13 = por %p553_p12, %p552_p11 }
  0x1e   :  { %p555_p0 = pnand %p554_p13, %p548_p10 }
  0x20   :  { %558 = shalt.err (!%p555_p0)
}
  0x21   :  { %50 = dma.hbm_to_vmem [thread:$0]  %s689_s3, 1024, %s45_s11, [#allocation5], %s586_s27, %s586_s27, %s587_s28  }
  0x22   :  { %s590_s17 = smov [#allocation7]  }
  0x23   :  { %s58_s18 = sshll.u32 %s590_s17, 4  ;;  %s59_s18 = int_to_ptr.vmem [resolvable:$true] %s58_s18 }
  0x24   :  { %s567_s19 = scalar_lea.vmem %s59_s18, 1024  ;;  %p572_p2 = scmp.lt.s32.totalorder %s59_s18, %s59_s18 }
  0x25   :  { %p568_p1 = scmp.ne.s32.totalorder %s59_s18, %s567_s19  ;;  %p573_p3 = scmp.lt.s32.totalorder %s567_s19, %s567_s19 }
  0x27   :  { %p574_p4 = por %p573_p3, %p572_p2 }
  0x29   :  { %p575_p5 = pnand %p574_p4, %p568_p1 }
  0x2b   :  { %578 = shalt.err (!%p575_p5)
}
  0x2c   :  { %64 = dma.hbm_to_vmem [thread:$0]  %s691_s5, 1024, %s59_s18, [#allocation8], %s586_s27, %s586_s27, %s587_s28  }
  0x2d   :  { %579 = dma.done.wait [#allocation3], 32  }
  0x2e   :  { %580 = vsyncadd [#allocation3], 4294967264 }
  0x2f   :  { %581 = dma.done.wait [#allocation5], 1152  }
  0x30   :  { %582 = vsyncadd [#allocation5], 4294966144 }
  0x31   :  { %583 = dma.done.wait [#allocation8], 1024  }
  0x32   :  { %584 = vsyncadd [#allocation8], 4294966272  ;;  %v591_v0 = vmov 0.0   ;;  %vm592_vm0 = vmmov 0   ;;  %v478_v1 = vld [vmem:[#allocation4] sm:$0xff]   ;;  %vm97_vm1 = vcmask 130048  }
  0x33   :  { %424 = vmatprep.subr.bf16.mxu0 %v591_v0  ;;  %426 = vmatprep.mubr.msk.bf16.mxu0 %vm592_vm0, %v591_v0  ;;  %v80_v2 = vld [vmem:[#allocation2] sm:$0x3]  ;;  %v479_v4 = vld [vmem:[#allocation6 + $0x38] sm:$0xff]   ;;  %v481_v6 = vld [vmem:[#allocation6 + $0x28] sm:$0xff]  }
  0x34   :  { %430 = vmatprep.subr.bf16.mxu1 %v591_v0  ;;  %446 = vmatprep.mubr.msk.bf16.mxu1 %vm592_vm0, %v591_v0  ;;  %v81_v3 = vpack.c.bf16 %v80_v2, %v80_v2  ;;  %v480_v5 = vld [vmem:[#allocation6 + $0x30] sm:$0xff]   ;;  %v482_v7 = vld [vmem:[#allocation6 + $0x20] sm:$0xff]   ;;  %v483_v8 = vld [vmem:[#allocation6 + $0x18] sm:$0xff]  }
  0x35   :  { %425 = vmatpush3.bf16.msra.mxu0 %v478_v1  ;;  %431 = vmatpush3.bf16.msra.mxu1 %v479_v4  ;;  %v484_v9 = vld [vmem:[#allocation6 + $0x10] sm:$0xff]   ;;  %v485_v10 = vld [vmem:[#allocation6 + $0x8] sm:$0xff]   ;;  %v486_v11 = vld [vmem:[#allocation6] sm:$0xff]  }
  0x36   :  { %450 = vmatprep.subr.bf16.mxu0 %v591_v0  ;;  %432 = vmatprep.subr.bf16.mxu1 %v591_v0  ;;  %v487_v12 = vld [vmem:[#allocation7 + $0x38] sm:$0xff]   ;;  %v383_v13 = vld [vmem:[%s688_s2] ss:$0 sm:$0xff]  ;;  %v489_v26 = vld [vmem:[#allocation7 + $0x28] sm:$0xff]  }
  0x37   :  { %v488_v25 = vld [vmem:[#allocation7 + $0x30] sm:$0xff]   ;;  %v490_v27 = vld [vmem:[#allocation7 + $0x20] sm:$0xff]   ;;  %v491_v28 = vld [vmem:[#allocation7 + $0x18] sm:$0xff]  }
  0x38   :  { %427 = vmatmul.mubr.msk.bf16.vlgmr.msra.gmra.mxu0 %vm97_vm1, %v81_v3  ;;  %v492_v29 = vld [vmem:[#allocation7 + $0x10] sm:$0xff]   ;;  %v493_v30 = vld [vmem:[#allocation7 + $0x8] sm:$0xff]   ;;  %v494_v31 = vld [vmem:[#allocation7] sm:$0xff]  }
  0x39   :  { %466 = vmatprep.mubr.msk.bf16.mxu0 %vm592_vm0, %v591_v0  ;;  %433 = vmatpush3.bf16.msra.mxu1 %v480_v5  ;;  %v386_v32 = vld [vmem:[%s690_s4] ss:$0 sm:$0xff] }
  0x3a   :  { %434 = vmatprep.subr.bf16.mxu1 %v591_v0  ;;  %451 = vmatpush3.bf16.msra.mxu0 %v487_v12  ;;  %v395_v44 = vld [vmem:[%s692_s6] ss:$0 sm:$0xff] }
  0x3b   :  { %452 = vmatprep.subr.bf16.mxu0 %v591_v0 }
  0x3d   :  { %435 = vmatpush3.bf16.msra.mxu1 %v481_v6 }
  0x3e   :  { %436 = vmatprep.subr.bf16.mxu1 %v591_v0  ;;  %453 = vmatpush3.bf16.msra.mxu0 %v488_v25 }
  0x3f   :  { %454 = vmatprep.subr.bf16.mxu0 %v591_v0 }
  0x41   :  { %437 = vmatpush3.bf16.msra.mxu1 %v482_v7 }
  0x42   :  { %438 = vmatprep.subr.bf16.mxu1 %v591_v0  ;;  %455 = vmatpush3.bf16.msra.mxu0 %v489_v26 }
  0x43   :  { %456 = vmatprep.subr.bf16.mxu0 %v591_v0 }
  0x45   :  { %439 = vmatpush3.bf16.msra.mxu1 %v483_v8 }
  0x46   :  { %440 = vmatprep.subr.bf16.mxu1 %v591_v0  ;;  %457 = vmatpush3.bf16.msra.mxu0 %v490_v27 }
  0x47   :  { %458 = vmatprep.subr.bf16.mxu0 %v591_v0 }
  0x49   :  { %441 = vmatpush3.bf16.msra.mxu1 %v484_v9 }
  0x4a   :  { %442 = vmatprep.subr.bf16.mxu1 %v591_v0  ;;  %459 = vmatpush3.bf16.msra.mxu0 %v491_v28 }
  0x4b   :  { %460 = vmatprep.subr.bf16.mxu0 %v591_v0 }
  0x4d   :  { %443 = vmatpush3.bf16.msra.mxu1 %v485_v10 }
  0x4e   :  { %444 = vmatprep.subr.bf16.mxu1 %v591_v0  ;;  %461 = vmatpush3.bf16.msra.mxu0 %v492_v29 }
  0x4f   :  { %462 = vmatprep.subr.bf16.mxu0 %v591_v0 }
  0x51   :  { %445 = vmatpush3.bf16.msra.mxu1 %v486_v11 }
  0x52   :  { %463 = vmatpush3.bf16.msra.mxu0 %v493_v30 }
  0x53   :  { %464 = vmatprep.subr.bf16.mxu0 %v591_v0 }
  0x56   :  { %465 = vmatpush3.bf16.msra.mxu0 %v494_v31 }
  0xf8   :  { %v135_v14 = vpop.f32.mrf.mxu0 }
  0xf9   :  { %v136_v15 = vadd.f32 %v383_v13, %v135_v14 }
  0xfa   :  { %v428_v16 = vpop.f32.mrf.mxu0 }
  0xfb   :  { %v141_v17 = vmul.f32 0.5, %v136_v15 }
  0xfc   :  { %v138_v18 = vpop.f32.mrf.mxu0 }
  0xfd   :  { %495 = vtanh.f32 %v141_v17 }
  0xfe   :  { %v429_v19 = vpop.f32.mrf.mxu0 }
 0x10a   :  { %v496_v20 = vpop.eup %495 }
 0x10b   :  { %v143_v21 = vadd.f32 1.0, %v496_v20 }
 0x10d   :  { %v144_v22 = vmul.f32 0.5, %v143_v21 }
 0x10f   :  { %v145_v23 = vmul.f32 %v144_v22, %v136_v15 }
 0x111   :  { %v146_v24 = vpack.c.bf16 %v145_v23, %v145_v23 }
 0x113   :  { %447 = vmatmul.mubr.bf16.vlgmr.msra.gmra.mxu1 %v146_v24 }
 0x1d3   :  { %v252_v33 = vpop.f32.mrf.mxu1 }
 0x1d4   :  { %v253_v34 = vadd.f32 %v386_v32, %v252_v33 }
 0x1d5   :  { %v448_v35 = vpop.f32.mrf.mxu1 }
 0x1d6   :  { %v258_v36 = vmul.f32 0.5, %v253_v34 }
 0x1d7   :  { %v255_v37 = vpop.f32.mrf.mxu1 }
 0x1d8   :  { %497 = vtanh.f32 %v258_v36 }
 0x1d9   :  { %v449_v38 = vpop.f32.mrf.mxu1 }
 0x1e5   :  { %v498_v39 = vpop.eup %497 }
 0x1e6   :  { %v260_v40 = vadd.f32 1.0, %v498_v39 }
 0x1e8   :  { %v261_v41 = vmul.f32 0.5, %v260_v40 }
 0x1ea   :  { %v262_v42 = vmul.f32 %v261_v41, %v253_v34 }
 0x1ec   :  { %v263_v43 = vpack.c.bf16 %v262_v42, %v262_v42 }
 0x1ee   :  { %467 = vmatmul.mubr.bf16.vlgmr.msra.gmra.mxu0 %v263_v43 }
 0x2ae   :  { %v369_v45 = vpop.f32.mrf.mxu0 }
 0x2af   :  { %v370_v46 = vadd.f32 %v395_v44, %v369_v45 }
 0x2b0   :  { %v468_v47 = vpop.f32.mrf.mxu0 }
 0x2b1   :  { %375 = vst [vmem:[%s693_s7] sm:$0x3] %v370_v46 }
 0x2b2   :  { %v372_v48 = vpop.f32.mrf.mxu0 }
 0x2b4   :  { %v469_v49 = vpop.f32.mrf.mxu0 }
 0x2b5   :  { %380 = vsyncpa [#allocation3], 1 }
 0x2b6   :  { %381 = vsyncpa [#allocation5], 1 }
 0x2b7   :  { %382 = vsyncpa [#allocation8], 1 }

</bundles_post_ra>
